<compile_context>
chip_gen: v7x
topology: tpu7x:2x2x1
jax: 0.10.0
libtpu: 0.0.40
codegen_flags: <defaults>
</compile_context>

<pallas_src>
import functools

import jax
import jax.numpy as jnp
import numpy as np
from jax.experimental import pallas as pl
from jax.experimental.pallas import tpu as pltpu

EPS = 1e-5
LANE = 128
SUBLANE = 8
HI = jax.lax.Precision.HIGHEST  # reference only


def _round_up(n, m):
    return ((n + m - 1) // m) * m


def _pad_axis(a, axis, target):
    pad = target - a.shape[axis]
    if pad == 0:
        return a
    cfg = [(0, 0)] * a.ndim
    cfg[axis] = (0, pad)
    return jnp.pad(a, cfg)


def _tile_policy():
    """(target_rows, vmem_limit_bytes, min_grid_steps) per TPU generation."""
    try:
        kind = jax.devices()[0].device_kind.lower()
    except Exception:
        kind = ""
    if "v2" in kind or "v3" in kind:
        return 512, 12 * 1024 * 1024, 2
    if "v5" in kind or "v6" in kind:
        # Single TensorCore, 128 MiB physical VMEM: few big serial tiles to amortize
        # the ~0.35us/step grid overhead.
        return 2048, 96 * 1024 * 1024, 1
    # v7x (2 TCs, 64 MiB per-TC VMEM) and unknown chips: conservative per-step budget,
    # keep >= 2 grid steps so both TensorCores get work.
    return 512, 48 * 1024 * 1024, 2


def bottleneck_kernel(x_ref, w1_ref, b1_ref, w2_ref, b2_ref, w3_ref, b3_ref,
                      o_ref, *, seq_len_pad, seq_len_real):
    # x_ref: (M, Cin_p) bf16, M = (batch tile) * padded seq len, channels on lanes.
    # Weights are bf16 with the BN scale pre-folded; biases are f32.
    xb = x_ref[...]

    # conv1x1 (BN1 scale folded into the weight) -> bias -> ReLU
    h1 = jnp.dot(xb, w1_ref[...], preferred_element_type=jnp.float32)
    h1 = jnp.maximum(h1 + b1_ref[...], 0.0)                               # (M, W_p) f32

    # conv k=3 (pad=1, stride=1): h2[l] = h1[l-1]@w2[0] + h1[l]@w2[1] + h1[l+1]@w2[2]
    # Shift the conv input by +/-1 row via pltpu.roll and zero the rows that would read
    # across a sequence boundary (reproduces the conv's zero padding and isolates
    # sequences / pad rows inside the tile), then accumulate the three tap matmuls.
    m = h1.shape[0]
    pos = jax.lax.broadcasted_iota(jnp.int32, (m, 1), 0) % seq_len_pad
    prev = jnp.where(pos == 0, 0.0, pltpu.roll(h1, 1, 0))                 # h1[l-1]
    nxt = jnp.where(pos >= seq_len_real - 1, 0.0, pltpu.roll(h1, m - 1, 0))  # h1[l+1]

    h1b = h1.astype(jnp.bfloat16)
    h2 = jnp.dot(prev.astype(jnp.bfloat16), w2_ref[0],
                 preferred_element_type=jnp.float32)
    h2 += jnp.dot(h1b, w2_ref[1], preferred_element_type=jnp.float32)
    h2 += jnp.dot(nxt.astype(jnp.bfloat16), w2_ref[2],
                  preferred_element_type=jnp.float32)
    h2 = jnp.maximum(h2 + b2_ref[...], 0.0)                               # (M, W_p) f32

    # conv1x1 (BN3 scale folded) -> bias -> identity residual (f32) -> final ReLU
    h3 = jnp.dot(h2.astype(jnp.bfloat16), w3_ref[...],
                 preferred_element_type=jnp.float32)
    o_ref[...] = jnp.maximum(h3 + b3_ref[...] + xb.astype(jnp.float32), 0.0)


def bottleneck_forward(x_blc, folded):
    """x_blc: (B, L, Cin) float32.  folded: transposed conv weights + folded BN params.
    Returns (B, L, Cout) float32."""
    w1, s1, b1, w2, s2, b2, w3, s3, b3 = folded
    B, L, Cin = x_blc.shape
    W = w1.shape[1]
    Cout = w3.shape[1]
    assert Cin == Cout, "identity residual path requires Cin == planes * expansion"

    cin_p = _round_up(Cin, LANE)
    w_p = _round_up(W, LANE)
    cout_p = _round_up(Cout, LANE)
    l_p = _round_up(L, SUBLANE)

    # Fold BN scales into the conv weights in f32, pad channel dims lane-dense, then
    # cast to bf16 (one rounding step).  Biases stay f32.
    w1f = w1 * s1                          # (Cin, W) * (1, W)
    w2f = w2 * s2.reshape(1, 1, -1)        # (3, W_in, W_out) * (1, 1, W_out)
    w3f = w3 * s3                          # (W, Cout) * (1, Cout)
    w1p = _pad_axis(_pad_axis(w1f, 0, cin_p), 1, w_p).astype(jnp.bfloat16)
    w2p = _pad_axis(_pad_axis(w2f, 1, w_p), 2, w_p).astype(jnp.bfloat16)
    w3p = _pad_axis(_pad_axis(w3f, 0, w_p), 1, cout_p).astype(jnp.bfloat16)
    b1p = _pad_axis(b1, 1, w_p)
    b2p = _pad_axis(b2, 1, w_p)
    b3p = _pad_axis(b3, 1, cout_p)

    # Pad channels + sequence length (to a sublane multiple), flatten (B, L) into the
    # matmul M dimension and stream as bf16.  Tiles hold whole (padded) sequences so
    # the k=3 halo never crosses a tile boundary.
    xp = _pad_axis(_pad_axis(x_blc, 2, cin_p), 1, l_p)          # (B, L_p, Cin_p)
    x2 = xp.reshape(B * l_p, cin_p).astype(jnp.bfloat16)

    # Generation-aware batch-tile choice.
    target_rows, vmem_bytes, min_steps = _tile_policy()
    bt = max(1, min(B, target_rows // l_p))
    if min_steps >= 2 and B >= 2:
        bt = min(bt, B // 2)               # keep both v7x TensorCores busy
    while B % bt:
        bt -= 1

    def _est_bytes(rows):
        # Per-grid-step VMEM working set, budgeting for default double-buffering of
        # both the streamed blocks and the constant weight operands.
        io = 2 * rows * (cin_p * 2 + cout_p * 4)
        consts = 2 * 2 * (cin_p * w_p + 3 * w_p * w_p + w_p * cout_p) \
            + 2 * 4 * (2 * w_p + cout_p)
        temps = rows * w_p * (4 * 3 + 2 * 3)   # h1/prev/nxt f32 + bf16 copies (rough)
        return io + consts + temps

    while bt > 1 and _est_bytes(bt * l_p) > int(0.75 * vmem_bytes):
        bt -= 1
        while B % bt:
            bt -= 1
    m_tile = bt * l_p
    grid = (B // bt,)

    def const2(i):
        return (0, 0)

    def const3(i):
        return (0, 0, 0)

    out = pl.pallas_call(
        functools.partial(bottleneck_kernel, seq_len_pad=l_p, seq_len_real=L),
        out_shape=jax.ShapeDtypeStruct((B * l_p, cout_p), jnp.float32),
        grid_spec=pltpu.PrefetchScalarGridSpec(
            num_scalar_prefetch=0,
            grid=grid,
            in_specs=[
                pl.BlockSpec((m_tile, cin_p), lambda i: (i, 0)),      # x (bf16)
                pl.BlockSpec((cin_p, w_p), const2),                   # conv1 w (scale folded)
                pl.BlockSpec((1, w_p), const2),                       # bn1 bias
                pl.BlockSpec((3, w_p, w_p), const3),                  # conv2 w (scale folded)
                pl.BlockSpec((1, w_p), const2),                       # bn2 bias
                pl.BlockSpec((w_p, cout_p), const2),                  # conv3 w (scale folded)
                pl.BlockSpec((1, cout_p), const2),                    # bn3 bias
            ],
            out_specs=pl.BlockSpec((m_tile, cout_p), lambda i: (i, 0)),
        ),
        compiler_params=pltpu.CompilerParams(
            dimension_semantics=("parallel",),
            vmem_limit_bytes=vmem_bytes),
    )(x2, w1p, b1p, w2p, b2p, w3p, b3p)

    return out.reshape(B, l_p, cout_p)[:, :L, :Cout]


def init_params(key, inplanes, planes, base_width=64, groups=1):
    width = int(planes * (base_width / 64.0)) * groups
    cout = planes * 4  # expansion = 4
    ks = jax.random.split(key, 15)

    def conv_w(k, o, i, ksz):
        return jax.random.normal(k, (o, i, ksz), jnp.float32) * 0.1

    w1 = conv_w(ks[0], width, inplanes, 1)   # PyTorch layout (O, I, K)
    w2 = conv_w(ks[1], width, width, 3)
    w3 = conv_w(ks[2], cout, width, 1)

    def bn(kg, kb, km, kv, c):
        gamma = 1.0 + 0.1 * jax.random.normal(kg, (c,), jnp.float32)
        beta = 0.1 * jax.random.normal(kb, (c,), jnp.float32)
        mean = 0.1 * jax.random.normal(km, (c,), jnp.float32)
        var = jax.random.uniform(kv, (c,), jnp.float32, minval=0.5, maxval=1.5)
        s = gamma / jnp.sqrt(var + EPS)
        b = beta - mean * s
        return s.reshape(1, c), b.reshape(1, c)

    s1, b1 = bn(ks[3], ks[4], ks[5], ks[6], width)
    s2, b2 = bn(ks[7], ks[8], ks[9], ks[10], width)
    s3, b3 = bn(ks[11], ks[12], ks[13], ks[14], cout)

    raw = (w1, w2, w3, (s1, b1), (s2, b2), (s3, b3))
    folded = (
        jnp.transpose(w1[:, :, 0]),          # (Cin, W)
        s1, b1,
        jnp.transpose(w2, (2, 1, 0)),        # (3, W_in, W_out) — tap index first
        s2, b2,
        jnp.transpose(w3[:, :, 0]),          # (W, Cout)
        s3, b3,
    )
    return raw, folded


def reference_ncl(x_ncl, raw):
    """Pure-JAX f32 reference on the original NCL layout (PyTorch eval-mode math)."""
    w1, w2, w3, bn1, bn2, bn3 = raw

    def conv1d(x, w, pad):
        return jax.lax.conv_general_dilated(
            x, w, window_strides=(1,), padding=[(pad, pad)],
            dimension_numbers=('NCH', 'OIH', 'NCH'), precision=HI)

    def bn(x, sb):
        s, b = sb
        return x * s.reshape(1, -1, 1) + b.reshape(1, -1, 1)

    out = jax.nn.relu(bn(conv1d(x_ncl, w1, 0), bn1))
    out = jax.nn.relu(bn(conv1d(out, w2, 1), bn2))
    out = bn(conv1d(out, w3, 0), bn3)
    return jax.nn.relu(out + x_ncl)


if __name__ == "__main__":
    # TODO(synk): BatchNorm1d is modeled in eval mode (running stats folded into the
    # weights / per-channel bias); training-mode batch statistics are not computed.
    # TODO(synk): intra-sequence L tiling with halo exchange is not implemented; tiles
    # always contain whole (pad-to-8) sequences and batch is the tiled axis.
    # TODO(synk): pl.Buffered(1) single-buffering of the constant weight operands and
    # the N/K-stacked conv2 tap matmul (narrow-width MXU fill) are not applied; the
    # VMEM guard budgets for default double-buffering instead.
    B, L = 2, 16
    planes = 8
    inplanes = planes * 4            # downsample=None requires Cin == planes * expansion
    key = jax.random.PRNGKey(0)
    kx, kp = jax.random.split(key)

    x_ncl = jax.random.normal(kx, (B, inplanes, L), jnp.float32)   # PyTorch NCL input
    raw, folded = init_params(kp, inplanes, planes)

    x_blc = jnp.transpose(x_ncl, (0, 2, 1))                        # (B, L, C) for the kernel
    out_blc = jax.block_until_ready(bottleneck_forward(x_blc, folded))
    out_ncl = jnp.transpose(out_blc, (0, 2, 1))

    ref = jax.block_until_ready(reference_ncl(x_ncl, raw))
    # bf16 MXU matmuls (f32 accumulation) + bf16-streamed input compared against an
    # all-f32 reference, hence the relaxed tolerance.
    np.testing.assert_allclose(np.asarray(out_ncl), np.asarray(ref),
                               rtol=2e-2, atol=2e-2)
    print("KERNEL_OK")
</pallas_src>

<mosaic_0001>
module attributes {stable_mosaic.version = 11 : i64} {
  func.func @bottleneck_kernel(%arg0: i32, %arg1: memref<16x128xbf16, #tpu.memory_space<vmem>>, %arg2: memref<128x128xbf16, #tpu.memory_space<vmem>>, %arg3: memref<1x128xf32, #tpu.memory_space<vmem>>, %arg4: memref<3x128x128xbf16, #tpu.memory_space<vmem>>, %arg5: memref<1x128xf32, #tpu.memory_space<vmem>>, %arg6: memref<128x128xbf16, #tpu.memory_space<vmem>>, %arg7: memref<1x128xf32, #tpu.memory_space<vmem>>, %arg8: memref<16x128xf32, #tpu.memory_space<vmem>>) attributes {dimension_semantics = [#tpu.dimension_semantics<parallel>], iteration_bounds = array<i64: 2>, scalar_prefetch = 0 : i64, scratch_operands = 0 : i64, tpu.core_type = #tpu.core_type<tc>, window_params = [{transform_indices = @transform_0, window_bounds = array<i64: 16, 128>}, {pipeline_mode = #tpu.pipeline_mode<synchronous>, transform_indices = @transform_1, window_bounds = array<i64: 128, 128>}, {pipeline_mode = #tpu.pipeline_mode<synchronous>, transform_indices = @transform_2, window_bounds = array<i64: 1, 128>}, {pipeline_mode = #tpu.pipeline_mode<synchronous>, transform_indices = @transform_3, window_bounds = array<i64: 3, 128, 128>}, {pipeline_mode = #tpu.pipeline_mode<synchronous>, transform_indices = @transform_4, window_bounds = array<i64: 1, 128>}, {pipeline_mode = #tpu.pipeline_mode<synchronous>, transform_indices = @transform_5, window_bounds = array<i64: 128, 128>}, {pipeline_mode = #tpu.pipeline_mode<synchronous>, transform_indices = @transform_6, window_bounds = array<i64: 1, 128>}, {transform_indices = @transform_7, window_bounds = array<i64: 16, 128>}]} {
    %c0 = arith.constant 0 : index
    %c0_0 = arith.constant 0 : index
    %0 = vector.load %arg1[%c0, %c0_0] : memref<16x128xbf16, #tpu.memory_space<vmem>>, vector<16x128xbf16>
    %c0_1 = arith.constant 0 : index
    %c0_2 = arith.constant 0 : index
    %1 = vector.load %arg2[%c0_1, %c0_2] : memref<128x128xbf16, #tpu.memory_space<vmem>>, vector<128x128xbf16>
    %cst = arith.constant dense<0.000000e+00> : vector<16x128xf32>
    %2 = tpu.matmul %0, %1, %cst {dimension_numbers = #tpu.dot_dimension_numbers<[1], [0], [0], [1], [0, 0, 1, 1], [], []>} : vector<16x128xbf16>, vector<128x128xbf16>, vector<16x128xf32> -> vector<16x128xf32>
    %c0_3 = arith.constant 0 : index
    %c0_4 = arith.constant 0 : index
    %3 = vector.load %arg3[%c0_3, %c0_4] : memref<1x128xf32, #tpu.memory_space<vmem>>, vector<1x128xf32>
    %4 = vector.broadcast %3 : vector<1x128xf32> to vector<16x128xf32>
    %5 = arith.addf %2, %4 : vector<16x128xf32>
    %cst_5 = arith.constant 0.000000e+00 : f32
    %6 = vector.broadcast %cst_5 : f32 to vector<16x128xf32>
    %7 = arith.maximumf %5, %6 : vector<16x128xf32>
    %8 = tpu.iota {dimensions = array<i32: 0>} : vector<16x1xi32>
    %c16_i32 = arith.constant 16 : i32
    %c0_i32 = arith.constant 0 : i32
    %9 = arith.cmpi eq, %c16_i32, %c0_i32 : i32
    %c1_i32 = arith.constant 1 : i32
    %10 = arith.select %9, %c1_i32, %c16_i32 : i32
    %11 = vector.broadcast %10 : i32 to vector<16x1xi32>
    %12 = arith.remsi %8, %11 : vector<16x1xi32>
    %c0_i32_6 = arith.constant 0 : i32
    %13 = vector.broadcast %c0_i32_6 : i32 to vector<16x1xi32>
    %14 = arith.cmpi ne, %12, %13 : vector<16x1xi32>
    %c0_i32_7 = arith.constant 0 : i32
    %15 = vector.broadcast %c0_i32_7 : i32 to vector<16x1xi32>
    %16 = arith.cmpi slt, %12, %15 : vector<16x1xi32>
    %c0_i32_8 = arith.constant 0 : i32
    %17 = arith.cmpi slt, %10, %c0_i32_8 : i32
    %18 = vector.broadcast %17 : i1 to vector<16x1xi1>
    %19 = vector.broadcast %18 : vector<16x1xi1> to vector<16x1xi1>
    %20 = arith.xori %16, %19 : vector<16x1xi1>
    %21 = arith.andi %20, %14 : vector<16x1xi1>
    %22 = vector.broadcast %10 : i32 to vector<16x1xi32>
    %23 = arith.addi %12, %22 : vector<16x1xi32>
    %24 = arith.select %21, %23, %12 : vector<16x1xi1>, vector<16x1xi32>
    %c0_i32_9 = arith.constant 0 : i32
    %25 = vector.broadcast %c0_i32_9 : i32 to vector<16x1xi32>
    %26 = arith.cmpi eq, %24, %25 : vector<16x1xi32>
    %c1_i32_10 = arith.constant 1 : i32
    %27 = tpu.dynamic_rotate %7 by %c1_i32_10 dim 0 : vector<16x128xf32>, i32 -> vector<16x128xf32>
    %cst_11 = arith.constant 0.000000e+00 : f32
    %28 = vector.shape_cast %26 : vector<16x1xi1> to vector<16x1xi1>
    %29 = vector.broadcast %28 : vector<16x1xi1> to vector<16x128xi1>
    %30 = vector.broadcast %cst_11 : f32 to vector<16x128xf32>
    %31 = arith.select %29, %30, %27 : vector<16x128xi1>, vector<16x128xf32>
    %c15_i32 = arith.constant 15 : i32
    %32 = vector.broadcast %c15_i32 : i32 to vector<16x1xi32>
    %33 = arith.cmpi sge, %24, %32 : vector<16x1xi32>
    %c15_i32_12 = arith.constant 15 : i32
    %34 = tpu.dynamic_rotate %7 by %c15_i32_12 dim 0 : vector<16x128xf32>, i32 -> vector<16x128xf32>
    %cst_13 = arith.constant 0.000000e+00 : f32
    %35 = vector.shape_cast %33 : vector<16x1xi1> to vector<16x1xi1>
    %36 = vector.broadcast %35 : vector<16x1xi1> to vector<16x128xi1>
    %37 = vector.broadcast %cst_13 : f32 to vector<16x128xf32>
    %38 = arith.select %36, %37, %34 : vector<16x128xi1>, vector<16x128xf32>
    %39 = arith.truncf %7 : vector<16x128xf32> to vector<16x128xbf16>
    %40 = arith.truncf %31 : vector<16x128xf32> to vector<16x128xbf16>
    %c0_14 = arith.constant 0 : index
    %c0_15 = arith.constant 0 : index
    %c0_16 = arith.constant 0 : index
    %41 = vector.load %arg4[%c0_14, %c0_15, %c0_16] : memref<3x128x128xbf16, #tpu.memory_space<vmem>>, vector<1x128x128xbf16>
    %42 = vector.shape_cast %41 : vector<1x128x128xbf16> to vector<128x128xbf16>
    %cst_17 = arith.constant dense<0.000000e+00> : vector<16x128xf32>
    %43 = tpu.matmul %40, %42, %cst_17 {dimension_numbers = #tpu.dot_dimension_numbers<[1], [0], [0], [1], [0, 0, 1, 1], [], []>} : vector<16x128xbf16>, vector<128x128xbf16>, vector<16x128xf32> -> vector<16x128xf32>
    %c1 = arith.constant 1 : index
    %c0_18 = arith.constant 0 : index
    %c0_19 = arith.constant 0 : index
    %44 = vector.load %arg4[%c1, %c0_18, %c0_19] : memref<3x128x128xbf16, #tpu.memory_space<vmem>>, vector<1x128x128xbf16>
    %45 = vector.shape_cast %44 : vector<1x128x128xbf16> to vector<128x128xbf16>
    %cst_20 = arith.constant dense<0.000000e+00> : vector<16x128xf32>
    %46 = tpu.matmul %39, %45, %cst_20 {dimension_numbers = #tpu.dot_dimension_numbers<[1], [0], [0], [1], [0, 0, 1, 1], [], []>} : vector<16x128xbf16>, vector<128x128xbf16>, vector<16x128xf32> -> vector<16x128xf32>
    %47 = arith.addf %43, %46 : vector<16x128xf32>
    %48 = arith.truncf %38 : vector<16x128xf32> to vector<16x128xbf16>
    %c2 = arith.constant 2 : index
    %c0_21 = arith.constant 0 : index
    %c0_22 = arith.constant 0 : index
    %49 = vector.load %arg4[%c2, %c0_21, %c0_22] : memref<3x128x128xbf16, #tpu.memory_space<vmem>>, vector<1x128x128xbf16>
    %50 = vector.shape_cast %49 : vector<1x128x128xbf16> to vector<128x128xbf16>
    %cst_23 = arith.constant dense<0.000000e+00> : vector<16x128xf32>
    %51 = tpu.matmul %48, %50, %cst_23 {dimension_numbers = #tpu.dot_dimension_numbers<[1], [0], [0], [1], [0, 0, 1, 1], [], []>} : vector<16x128xbf16>, vector<128x128xbf16>, vector<16x128xf32> -> vector<16x128xf32>
    %52 = arith.addf %47, %51 : vector<16x128xf32>
    %c0_24 = arith.constant 0 : index
    %c0_25 = arith.constant 0 : index
    %53 = vector.load %arg5[%c0_24, %c0_25] : memref<1x128xf32, #tpu.memory_space<vmem>>, vector<1x128xf32>
    %54 = vector.broadcast %53 : vector<1x128xf32> to vector<16x128xf32>
    %55 = arith.addf %52, %54 : vector<16x128xf32>
    %cst_26 = arith.constant 0.000000e+00 : f32
    %56 = vector.broadcast %cst_26 : f32 to vector<16x128xf32>
    %57 = arith.maximumf %55, %56 : vector<16x128xf32>
    %58 = arith.truncf %57 : vector<16x128xf32> to vector<16x128xbf16>
    %c0_27 = arith.constant 0 : index
    %c0_28 = arith.constant 0 : index
    %59 = vector.load %arg6[%c0_27, %c0_28] : memref<128x128xbf16, #tpu.memory_space<vmem>>, vector<128x128xbf16>
    %cst_29 = arith.constant dense<0.000000e+00> : vector<16x128xf32>
    %60 = tpu.matmul %58, %59, %cst_29 {dimension_numbers = #tpu.dot_dimension_numbers<[1], [0], [0], [1], [0, 0, 1, 1], [], []>} : vector<16x128xbf16>, vector<128x128xbf16>, vector<16x128xf32> -> vector<16x128xf32>
    %c0_30 = arith.constant 0 : index
    %c0_31 = arith.constant 0 : index
    %61 = vector.load %arg7[%c0_30, %c0_31] : memref<1x128xf32, #tpu.memory_space<vmem>>, vector<1x128xf32>
    %62 = vector.broadcast %61 : vector<1x128xf32> to vector<16x128xf32>
    %63 = arith.addf %60, %62 : vector<16x128xf32>
    %64 = arith.extf %0 : vector<16x128xbf16> to vector<16x128xf32>
    %65 = arith.addf %63, %64 : vector<16x128xf32>
    %cst_32 = arith.constant 0.000000e+00 : f32
    %66 = vector.broadcast %cst_32 : f32 to vector<16x128xf32>
    %67 = arith.maximumf %65, %66 : vector<16x128xf32>
    %c0_33 = arith.constant 0 : index
    %c0_34 = arith.constant 0 : index
    %68 = vector.load %arg8[%c0_33, %c0_34] : memref<16x128xf32, #tpu.memory_space<vmem>>, vector<16x128xf32>
    tpu.vector_store %arg8[%c0_33, %c0_34], %67 {strides = array<i32>} : memref<16x128xf32, #tpu.memory_space<vmem>>, vector<16x128xf32>,
    return
  }
  func.func @transform_0(%arg0: i32) -> (i32, i32) {
    %c0_i32 = arith.constant 0 : i32
    %c0_i32_0 = arith.constant 0 : i32
    return %arg0, %c0_i32 : i32, i32
  }
  func.func @transform_1(%arg0: i32) -> (i32, i32) {
    %c0_i32 = arith.constant 0 : i32
    %c0_i32_0 = arith.constant 0 : i32
    %c0_i32_1 = arith.constant 0 : i32
    return %c0_i32, %c0_i32_0 : i32, i32
  }
  func.func @transform_2(%arg0: i32) -> (i32, i32) {
    %c0_i32 = arith.constant 0 : i32
    %c0_i32_0 = arith.constant 0 : i32
    %c0_i32_1 = arith.constant 0 : i32
    return %c0_i32, %c0_i32_0 : i32, i32
  }
  func.func @transform_3(%arg0: i32) -> (i32, i32, i32) {
    %c0_i32 = arith.constant 0 : i32
    %c0_i32_0 = arith.constant 0 : i32
    %c0_i32_1 = arith.constant 0 : i32
    %c0_i32_2 = arith.constant 0 : i32
    return %c0_i32, %c0_i32_0, %c0_i32_1 : i32, i32, i32
  }
  func.func @transform_4(%arg0: i32) -> (i32, i32) {
    %c0_i32 = arith.constant 0 : i32
    %c0_i32_0 = arith.constant 0 : i32
    %c0_i32_1 = arith.constant 0 : i32
    return %c0_i32, %c0_i32_0 : i32, i32
  }
  func.func @transform_5(%arg0: i32) -> (i32, i32) {
    %c0_i32 = arith.constant 0 : i32
    %c0_i32_0 = arith.constant 0 : i32
    %c0_i32_1 = arith.constant 0 : i32
    return %c0_i32, %c0_i32_0 : i32, i32
  }
  func.func @transform_6(%arg0: i32) -> (i32, i32) {
    %c0_i32 = arith.constant 0 : i32
    %c0_i32_0 = arith.constant 0 : i32
    %c0_i32_1 = arith.constant 0 : i32
    return %c0_i32, %c0_i32_0 : i32, i32
  }
  func.func @transform_7(%arg0: i32) -> (i32, i32) {
    %c0_i32 = arith.constant 0 : i32
    %c0_i32_0 = arith.constant 0 : i32
    return %arg0, %c0_i32 : i32, i32
  }
}

</mosaic_0001>

<bundles_post_ra>
// kernel: tpu_custom_call.1
= control target key start
LH: loop header
LB: loop body
LE: loop exit
PB: predicated region body
PF: predicated region fallthrough
CT: control target
= control target key end

     0   :  { %12 = vsyncpa [#allocation3], 0  ;;  %s2019_s0 = inlined_call_operand.hbm [shape: bf16[32,128], index: 0, kind: input, shape index: {}]   ;;  %s2020_s1 = inlined_call_operand.hbm [shape: bf16[128,128], index: 1, kind: input, shape index: {}]   ;;  %s2021_s2 = inlined_call_operand.vmem [shape: f32[1,128], index: 2, kind: input, shape index: {}]   ;;  %s2022_s3 = inlined_call_operand.hbm [shape: bf16[3,128,128], index: 3, kind: input, shape index: {}]   ;;  %s2023_s4 = inlined_call_operand.vmem [shape: f32[1,128], index: 4, kind: input, shape index: {}]   ;;  %s2024_s5 = inlined_call_operand.hbm [shape: bf16[128,128], index: 5, kind: input, shape index: {}]   ;;  %s2025_s6 = inlined_call_operand.vmem [shape: f32[1,128], index: 6, kind: input, shape index: {}]   ;;  %s2026_s7 = inlined_call_operand.hbm [shape: f32[32,128], index: 7, kind: output, shape index: {}]  }
   0x1   :  { %14 = vsyncpa [#allocation3 + $0x1], 0 }
   0x2   :  { %15 = vsyncpa [#allocation6], 0 }
   0x3   :  { %16 = vsyncpa [#allocation9], 0 }
   0x4   :  { %17 = vsyncpa [#allocation4], 0 }
   0x5   :  { %19 = vsyncpa [#allocation4 + $0x1], 0  ;;  %s1678_s24 = smov 0   ;;  %s1680_s25 = smov 0  }
   0x6   :  { %s1682_s26 = smov 0   ;;  %s1684_s27 = smov 0  }
   0x7 LB: > { %s1699_s28 = sadd.s32 4294967295, %s1624_s27   ;;  %s1089_s29 = sadd.s32 4294967294, %s1624_s27   ;;  %s1624_s27 = sphi %s1684_s27, %s2052_s27   ;;  %s1620_s26 = sphi %s1682_s26, %s2051_s26   ;;  %s1616_s25 = sphi %s1680_s25, %s2050_s25   ;;  %s1612_s24 = sphi %s1678_s24, %s2049_s24  }
   0x8   : > { %p45_p0 = scmp.ne.s32.totalorder %s1616_s25, %s1612_s24  ;;  %p2027_p1 = scmp.eq.s32.totalorder %s1699_s28, 0 }
   0x9   : > { %p201_p3 = scmp.eq.s32.totalorder %s1089_s29, 1  ;;  %p1090_p5 = scmp.ge.s32.totalorder %s1624_s27, 1 }
   0xa   : > { %p1708_p4 = por %p2027_p1, %p45_p0  ;;  %p208_p7 = scmp.lt.s32.totalorder %s1624_s27, 3 }
   0xb   : > { %p1713_p6 = por %p201_p3, %p45_p0  ;;  %s1626_s10 = smov [#allocation5]  }
   0xc   : > { %s2031_s30 = scalar_select %p1708_p4, 1, 0 }
   0xd   : > { %s2032_s8 = scalar_select %p1713_p6, 1, 0 }
   0xe   : > { %p1718_p8 = pnand %p1090_p5, %p208_p7  ;;  %s220_s11 = sshll.u32 %s1626_s10, 4  ;;  %s1722_s11 = int_to_ptr.vmem [resolvable:$true] %s220_s11 }
   0xf   : > { %2033 = sst [smem:[#allocation15_spill]] %s2032_s8  ;;  %s1627_s13 = smov [#allocation7]  }
  0x10   : > { %s2034_s9 = scalar_select %p1718_p8, 1, 0 }
  0x11   : > { %p1326_p9 = pneg %p1718_p8  ;;  %s236_s14 = sshll.u32 %s1627_s13, 4  ;;  %s1733_s14 = int_to_ptr.vmem [resolvable:$true] %s236_s14 }
  0x12   : > { %s1628_s15 = smov [#allocation8]   ;;  %s1436_s19 = scalar_lea.hbm %s2020_s1, 1024 }
  0x13   : > { %p1729_p11 = pnand %p1326_p9, %p2027_p1  ;;  %s1735_s16 = sshll.u32 %s1628_s15, 4  ;;  %s253_s16 = int_to_ptr.vmem [resolvable:$true] %s1735_s16 }
  0x14   : > { %p1437_p12 = scmp.ne.s32.totalorder %s2020_s1, %s1436_s19  ;;  %p1443_p5 = scmp.lt.u32.totalorder %s1436_s19, %s2020_s1 }
  0x15   : > { %p1745_p13 = pneg %p1729_p11 }
  0x17   : > { %p1439_p0 = pnand %p1745_p13, %p1437_p12 }
  0x19   : > { %p1440_p3 = pneg %p1439_p0 }
  0x1b   : > { %p1445_p7 = pnand %p1443_p5, %p1440_p3 }
  0x1d   : > { %1448 = shalt.err (!%p1445_p7)
}
  0x1e   : > { %s1449_s10 = scalar_lea.vmem %s1722_s11, 1024  ;;  %p1457_p2 = scmp.lt.s32.totalorder %s1722_s11, %s1722_s11 }
  0x1f   : > { %p1450_p9 = scmp.ne.s32.totalorder %s1722_s11, %s1449_s10  ;;  %p1458_p6 = scmp.lt.s32.totalorder %s1449_s10, %s1449_s10 }
  0x21   : > { %p1452_p10 = pnand %p1450_p9, %p1745_p13  ;;  %p1459_p12 = por %p1458_p6, %p1457_p2 }
  0x23   : > { %p1453_p1 = pneg %p1452_p10 }
  0x25   : > { %p1460_p0 = pnand %p1459_p12, %p1453_p1 }
  0x27   : > { %1463 = shalt.err (!%p1460_p0)
}
  0x28   : > { %s1629_s13 = smov 64   ;;  %s1630_s15 = smov 4  }
  0x29   : > { %1329 = dma.hbm_to_vmem [thread:$0]  (!%p1729_p11), %s2020_s1, 1024, %s1722_s11, [#allocation6], %s1629_s13, %s1629_s13, %s1630_s15  }
  0x2a   : > { %s1464_s21 = scalar_lea.hbm %s2022_s3, 3072 }
  0x2b   : > { %p1465_p1 = scmp.ne.s32.totalorder %s2022_s3, %s1464_s21  ;;  %p1471_p10 = scmp.lt.u32.totalorder %s1464_s21, %s2022_s3 }
  0x2d   : > { %p1467_p2 = pnand %p1465_p1, %p1745_p13 }
  0x2f   : > { %p1468_p6 = pneg %p1467_p2 }
  0x31   : > { %p1473_p3 = pnand %p1471_p10, %p1468_p6 }
  0x33   : > { %1476 = shalt.err (!%p1473_p3)
}
  0x34   : > { %s1477_s11 = scalar_lea.vmem %s1733_s14, 3072  ;;  %p1485_p12 = scmp.lt.s32.totalorder %s1733_s14, %s1733_s14 }
  0x35   : > { %p1478_p5 = scmp.ne.s32.totalorder %s1733_s14, %s1477_s11  ;;  %p1486_p0 = scmp.lt.s32.totalorder %s1477_s11, %s1477_s11 }
  0x37   : > { %p1480_p7 = pnand %p1478_p5, %p1745_p13  ;;  %p1487_p1 = por %p1486_p0, %p1485_p12 }
  0x39   : > { %p1481_p9 = pneg %p1480_p7 }
  0x3b   : > { %p1488_p2 = pnand %p1487_p1, %p1481_p9 }
  0x3d   : > { %1491 = shalt.err (!%p1488_p2)
}
  0x3e   : > { %1332 = dma.hbm_to_vmem [thread:$0]  (!%p1729_p11), %s2022_s3, 3072, %s1733_s14, [#allocation6], %s1629_s13, %s1629_s13, %s1630_s15  }
  0x3f   : > { %s1492_s20 = scalar_lea.hbm %s2024_s5, 1024 }
  0x40   : > { %p1493_p6 = scmp.ne.s32.totalorder %s2024_s5, %s1492_s20  ;;  %p1499_p5 = scmp.lt.u32.totalorder %s1492_s20, %s2024_s5 }
  0x42   : > { %p1495_p10 = pnand %p1493_p6, %p1745_p13 }
  0x44   : > { %p1496_p3 = pneg %p1495_p10 }
  0x46   : > { %p1501_p7 = pnand %p1499_p5, %p1496_p3 }
  0x48   : > { %1504 = shalt.err (!%p1501_p7)
}
  0x49   : > { %s1505_s11 = scalar_lea.vmem %s253_s16, 1024  ;;  %p1513_p1 = scmp.lt.s32.totalorder %s253_s16, %s253_s16 }
  0x4a   : > { %p1506_p9 = scmp.ne.s32.totalorder %s253_s16, %s1505_s11  ;;  %p1514_p2 = scmp.lt.s32.totalorder %s1505_s11, %s1505_s11 }
  0x4c   : > { %p1508_p12 = pnand %p1506_p9, %p1745_p13  ;;  %p1515_p4 = por %p1514_p2, %p1513_p1 }
  0x4e   : > { %p1509_p0 = pneg %p1508_p12 }
  0x50   : > { %p1516_p8 = pnand %p1515_p4, %p1509_p0 }
  0x52   : > { %1519 = shalt.err (!%p1516_p8)
}
  0x53   : > { %1335 = dma.hbm_to_vmem [thread:$0]  (!%p1729_p11), %s2024_s5, 1024, %s253_s16, [#allocation9], %s1629_s13, %s1629_s13, %s1630_s15  }
  0x54   : > { %s1818_s22 = sadd.s32 1, %s1624_s27   ;;  %s32_s17 = sadd.s32 1, %s1620_s26 }
  0x55   : > { %s29_s12 = ssub.s32 %s1624_s27, %s1818_s22  ;;  %p39_p8 = scmp.ne.s32.totalorder %s1620_s26, %s1616_s25 }
  0x56   : > { %p30_p4 = scmp.eq.s32.totalorder %s29_s12, 0  ;;  %p40_p13 = scmp.eq.s32.totalorder %s1624_s27, 0 }
  0x57   : > { %p1347_p6 = scmp.lt.s32.totalorder %s1624_s27, 2  ;;  %p2037_p3 = scmp.eq.s32.totalorder %s1699_s28, 1 }
  0x58   : > { %s1828_s18 = scalar_select %p30_p4, %s1620_s26, %s32_s17  }
  0x59   : > { %p41_p10 = por %p40_p13, %p39_p8  ;;  %p1832_p5 = por %p2037_p3, %p39_p8 }
  0x5a   : > { %s269_s20 = sand.u32 1, %s1620_s26   ;;  %s1161_s21 = sshll.u32 %s1624_s27, 7 }
  0x5b   : > { %s1095_s16 = sshll.u32 %s269_s20, 3  ;;  %s1841_s10 = scalar_lea.hbm %s2019_s0, %s1161_s21 }
  0x5c   : > { %s273_s11 = scalar_lea.vmem [#allocation2], %s1095_s16  ;;  %p1843_p11 = pnand %p1347_p6, %p41_p10 }
  0x5d   : > { %s280_s14 = sshll.u32 %s273_s11, 4  ;;  %s1849_s12 = scalar_lea.sflag [#allocation3], %s269_s20  ;;  %s1847_s14 = int_to_ptr.vmem [resolvable:$true] %s280_s14 }
  0x5e   : > { %s1520_s17 = scalar_lea.hbm %s1841_s10, 128  ;;  %p1522_p9 = pneg %p1843_p11 }
  0x5f   : > { %p1521_p7 = scmp.ne.s32.totalorder %s1841_s10, %s1520_s17  ;;  %s1525_s23 = scalar_lea.hbm %s2019_s0, 256 }
  0x60   : > { %p1526_p1 = scmp.lt.u32.totalorder %s1841_s10, %s2019_s0  ;;  %p1527_p2 = scmp.lt.u32.totalorder %s1525_s23, %s1520_s17 }
  0x61   : > { %p1523_p12 = pnand %p1522_p9, %p1521_p7  ;;  %p1529_p8 = scmp.lt.u32.totalorder %s1520_s17, %s1841_s10 }
  0x62   : > { %p1528_p4 = por %p1527_p2, %p1526_p1 }
  0x63   : > { %p1524_p0 = pneg %p1523_p12 }
  0x64   : > { %p1530_p13 = por %p1529_p8, %p1528_p4 }
  0x66   : > { %p1531_p6 = pnand %p1530_p13, %p1524_p0 }
  0x68   : > { %1534 = shalt.err (!%p1531_p6)
}
  0x69   : > { %s1535_s20 = scalar_lea.vmem %s1847_s14, 128  ;;  %s1631_s21 = smov [#allocation2]  }
  0x6a   : > { %p1536_p10 = scmp.ne.s32.totalorder %s1847_s14, %s1535_s20  ;;  %s1540_s16 = sshll.u32 %s1631_s21, 4  ;;  %s1541_s16 = int_to_ptr.vmem [resolvable:$false] %s1540_s16 }
  0x6b   : > { %s1542_s29 = scalar_lea.vmem %s1541_s16, 256  ;;  %p1543_p12 = scmp.lt.s32.totalorder %s1847_s14, %s1541_s16 }
  0x6c   : > { %p1538_p3 = pnand %p1536_p10, %p1522_p9  ;;  %p1544_p1 = scmp.lt.s32.totalorder %s1542_s29, %s1535_s20 }
  0x6e   : > { %p1539_p7 = pneg %p1538_p3  ;;  %p1545_p2 = por %p1544_p1, %p1543_p12 }
  0x70   : > { %p1546_p4 = pnand %p1545_p2, %p1539_p7 }
  0x72   : > { %1549 = shalt.err (!%p1546_p4)
}
  0x73   : > { %1339 = dma.hbm_to_vmem [thread:$0]  (!%p1843_p11), %s1841_s10, 128, %s1847_s14, %s1849_s12, %s1629_s13, %s1629_s13, %s1630_s15  }
  0x74   : > { %p2040_p9 = scmp.ne.s32.totalorder %s2034_s9, 0 }
  0x75   : > { %s1883_s17 = sand.u32 (!%p2040_p9), 1, %s1616_s25   ;;  %p2041_p0 = scmp.ne.s32.totalorder (!%p2040_p9), %s2031_s30, 0 }
  0x76   : > { %292 = sbr.rel (%p2040_p9) target bundleno = 876 (0x36c), region = 48  ;;  %s1099_s23 = sshll.u32 (!%p2040_p9), %s1883_s17, 3 }
  0x77   : > { %s295_s11 = scalar_lea.sflag (!%p2040_p9), [#allocation3], %s1883_s17  ;;  %s1887_s20 = scalar_lea.vmem (!%p2040_p9), [#allocation2], %s1099_s23 }
  0x7d   : > { %1595 = dma.done.wait (%p2041_p0), %s295_s11, 128  }
  0x7e   : > { %1597 = vsyncadd (%p2041_p0), %s295_s11, 4294967168  ;;  %p2042_p11 = scmp.eq.s32.totalorder %s1699_s28, 0 }
  0x80   : > { %1599 = dma.done.wait (%p2042_p11), [#allocation6], 4096   ;;  %p2043_p8 = pmov %p2042_p11 }
  0x82   : > { %1601 = vsyncadd (%p2043_p8), [#allocation6], 4294963200  ;;  %p2044_p13 = pmov %p2043_p8 }
  0x83   : > { %p2045_p6 = pmov %p2043_p8 }
  0x84   : > { %1603 = dma.done.wait (%p2044_p13), [#allocation9], 1024  }
  0x85   : > { %1605 = vsyncadd (%p2045_p6), [#allocation9], 4294966272  ;;  %v1632_v0 = vmov 0.0   ;;  %vm1633_vm0 = vmmov 0   ;;  %v1394_v1 = vld [vmem:[#allocation5] sm:$0xff]   ;;  %v1395_v2 = vld [vmem:[#allocation5 + $0x8] sm:$0xff]   ;;  %v466_v26 = vlaneseq }
  0x86   : > { %1210 = vmatprep.subr.bf16.mxu0 %v1632_v0  ;;  %1226 = vmatprep.mubr.msk.bf16.mxu0 %vm1633_vm0, %v1632_v0  ;;  %v1396_v3 = vld [vmem:[#allocation5 + $0x10] sm:$0xff]   ;;  %v1403_v4 = vld [vmem:[#allocation7 + $0x40] sm:$0xff]   ;;  %v1397_v5 = vld [vmem:[#allocation5 + $0x18] sm:$0xff]   ;;  %vm1634_vm4 = vmmov 1   ;;  %s1103_s10 = sshll.u32 %s1883_s17, 4  ;;  %s1162_s16 = sshll.u32 %s1699_s28, 8 }
  0x87   : > { %1230 = vmatprep.subr.bf16.mxu1 %v1632_v0  ;;  %1246 = vmatprep.mubr.msk.bf16.mxu1 %vm1633_vm0, %v1632_v0  ;;  %v1404_v6 = vld [vmem:[#allocation7 + $0x48] sm:$0xff]   ;;  %v1398_v7 = vld [vmem:[#allocation5 + $0x20] sm:$0xff]   ;;  %v1406_v8 = vld [vmem:[#allocation7 + $0x50] sm:$0xff]   ;;  %v467_v28 = vshrl.u32 %v466_v26, 7  ;;  %s340_s12 = scalar_lea.vmem [#allocation10], %s1103_s10  ;;  %s1975_s11 = scalar_lea.hbm %s2026_s7, %s1162_s16 }
  0x88   : > { %1211 = vmatpush3.bf16.msra.mxu0 %v1394_v1  ;;  %1231 = vmatpush3.bf16.msra.mxu1 %v1403_v4  ;;  %v1399_v9 = vld [vmem:[#allocation5 + $0x28] sm:$0xff]   ;;  %v1408_v10 = vld [vmem:[#allocation7 + $0x58] sm:$0xff]   ;;  %v1400_v11 = vld [vmem:[#allocation5 + $0x30] sm:$0xff]   ;;  %s987_s21 = sshll.u32 %s340_s12, 4  ;;  %s1635_s28 = smov [#allocation10]   ;;  %s1970_s21 = int_to_ptr.vmem [resolvable:$true] %s987_s21 }
  0x89   : > { %1212 = vmatprep.subr.bf16.mxu0 %v1632_v0  ;;  %1232 = vmatprep.subr.bf16.mxu1 %v1632_v0  ;;  %v1410_v12 = vld [vmem:[#allocation7 + $0x60] sm:$0xff]   ;;  %v1401_v13 = vld [vmem:[#allocation5 + $0x38] sm:$0xff]   ;;  %v1412_v15 = vld [vmem:[#allocation7 + $0x68] sm:$0xff]   ;;  %v473_v33 = vand.u32 15, %v467_v28  ;;  %vm497_vm1 = vcmp.lt.s32.totalorder %v467_v28, 1  ;;  %vm510_vm2 = vcmp.lt.s32.totalorder %v467_v28, 7 }
  0x8a   : > { %v1917_v14 = vld [vmem:[%s1887_s20] sm:$0xff]   ;;  %v1405_v16 = vld [vmem:[#allocation7] sm:$0xff]   ;;  %v1407_v17 = vld [vmem:[#allocation7 + $0x8] sm:$0xff]   ;;  %v468_v55 = vadd.s32 8, %v467_v28  ;;  %s974_s20 = scalar_lea.sflag [#allocation4], %s1883_s17  ;;  %s1550_s30 = scalar_lea.vmem %s1970_s21, 256 }
  0x8b   : > { %v1409_v18 = vld [vmem:[#allocation7 + $0x10] sm:$0xff]   ;;  %v1411_v19 = vld [vmem:[#allocation7 + $0x18] sm:$0xff]   ;;  %v1413_v20 = vld [vmem:[#allocation7 + $0x20] sm:$0xff]   ;;  %vm1163_vm3 = vcmp.ne.s32.totalorder %v473_v33, 0  ;;  %p1551_p10 = scmp.ne.s32.totalorder %s1970_s21, %s1550_s30  ;;  %s1554_s9 = sshll.u32 %s1635_s28, 4  ;;  %s1555_s9 = int_to_ptr.vmem [resolvable:$false] %s1554_s9 }
  0x8c   : > { %1213 = vmatpush3.bf16.msra.mxu0 %v1395_v2  ;;  %1233 = vmatpush3.bf16.msra.mxu1 %v1404_v6  ;;  %v1414_v21 = vld [vmem:[#allocation7 + $0x70] sm:$0xff]   ;;  %v1415_v22 = vld [vmem:[#allocation7 + $0x28] sm:$0xff]   ;;  %v1416_v23 = vld [vmem:[#allocation7 + $0x78] sm:$0xff]   ;;  %v480_v57 = vand.u32 15, %v468_v55  ;;  %s1556_s13 = scalar_lea.vmem %s1555_s9, 512  ;;  %p1557_p12 = scmp.lt.s32.totalorder %s1970_s21, %s1555_s9 }
  0x8d   : > { %1214 = vmatprep.subr.bf16.mxu0 %v1632_v0  ;;  %1234 = vmatprep.subr.bf16.mxu1 %v1632_v0  ;;  %v1417_v24 = vld [vmem:[#allocation7 + $0x30] sm:$0xff]   ;;  %v1418_v25 = vld [vmem:[#allocation7 + $0x38] sm:$0xff]   ;;  %v1419_v39 = vld [vmem:[#allocation7 + $0x80] sm:$0xff]   ;;  %p1552_p3 = pnand %p1551_p10, %p1832_p5  ;;  %p1558_p1 = scmp.lt.s32.totalorder %s1556_s13, %s1550_s30 }
  0x8e   : > { %v1104_v27 = vld [vmem:[%s2021_s2] ss:$0 sm:$0xff]  ;;  %vm1131_vm5 = vmpackc.low %vm1634_vm4, %vm1163_vm3  ;;  %v1420_v50 = vld [vmem:[#allocation7 + $0x88] sm:$0xff]   ;;  %vm1164_vm6 = vcmp.lt.s32.totalorder %v480_v57, 15 }
  0x8f   : > { %v1421_v51 = vld [vmem:[#allocation7 + $0x90] sm:$0xff]   ;;  %v1422_v52 = vld [vmem:[#allocation7 + $0x98] sm:$0xff]   ;;  %v1423_v53 = vld [vmem:[#allocation7 + $0xa0] sm:$0xff]   ;;  %p1553_p7 = pneg %p1552_p3  ;;  %p1559_p2 = por %p1558_p1, %p1557_p12 }
  0x90   : > { %1215 = vmatpush3.bf16.msra.mxu0 %v1396_v3  ;;  %1235 = vmatpush3.bf16.msra.mxu1 %v1406_v8  ;;  %v1424_v54 = vld [vmem:[#allocation7 + $0xa8] sm:$0xff]   ;;  %v1425_v56 = vld [vmem:[#allocation7 + $0xb0] sm:$0xff]   ;;  %v1426_v58 = vld [vmem:[#allocation7 + $0xb8] sm:$0xff]  }
  0x91   : > { %1216 = vmatprep.subr.bf16.mxu0 %v1632_v0  ;;  %1236 = vmatprep.subr.bf16.mxu1 %v1632_v0  ;;  %vm1143_vm7 = vmpackc.low %vm1164_vm6, %vm1634_vm4  ;;  %v1427_v59 = vld [vmem:[#allocation8] sm:$0xff]   ;;  %v1428_v60 = vld [vmem:[#allocation8 + $0x8] sm:$0xff]   ;;  %p1560_p4 = pnand %p1559_p2, %p1553_p7 }
  0x92   : > { %v1429_v61 = vld [vmem:[#allocation8 + $0x10] sm:$0xff]   ;;  %v1430_v62 = vld [vmem:[#allocation8 + $0x18] sm:$0xff]   ;;  %v1431_v63 = vld [vmem:[#allocation8 + $0x20] sm:$0xff]  }
  0x93   : > { %v1432_v1 = vld [vmem:[#allocation8 + $0x28] sm:$0xff]   ;;  %v1433_v2 = vld [vmem:[#allocation8 + $0x30] sm:$0xff]   ;;  %v1434_v3 = vld [vmem:[#allocation8 + $0x38] sm:$0xff]  }
  0x94   : > { %1217 = vmatpush3.bf16.msra.mxu0 %v1397_v5  ;;  %1237 = vmatpush3.bf16.msra.mxu1 %v1408_v10  ;;  %v1147_v26 = vld [vmem:[%s2025_s6] ss:$0 sm:$0xff] }
  0x95   : > { %1218 = vmatprep.subr.bf16.mxu0 %v1632_v0  ;;  %1238 = vmatprep.subr.bf16.mxu1 %v1632_v0 }
  0x98   : > { %1219 = vmatpush3.bf16.msra.mxu0 %v1398_v7  ;;  %1239 = vmatpush3.bf16.msra.mxu1 %v1410_v12 }
  0x99   : > { %1220 = vmatprep.subr.bf16.mxu0 %v1632_v0  ;;  %1240 = vmatprep.subr.bf16.mxu1 %v1632_v0 }
  0x9c   : > { %1221 = vmatpush3.bf16.msra.mxu0 %v1399_v9  ;;  %1241 = vmatpush3.bf16.msra.mxu1 %v1412_v15 }
  0x9d   : > { %1222 = vmatprep.subr.bf16.mxu0 %v1632_v0  ;;  %1242 = vmatprep.subr.bf16.mxu1 %v1632_v0 }
  0xa0   : > { %1223 = vmatpush3.bf16.msra.mxu0 %v1400_v11  ;;  %1243 = vmatpush3.bf16.msra.mxu1 %v1414_v21 }
  0xa1   : > { %1224 = vmatprep.subr.bf16.mxu0 %v1632_v0  ;;  %1244 = vmatprep.subr.bf16.mxu1 %v1632_v0 }
  0xa4   : > { %1225 = vmatpush3.bf16.msra.mxu0 %v1401_v13  ;;  %1245 = vmatpush3.bf16.msra.mxu1 %v1416_v23 }
  0xa5   : > { %1250 = vmatprep.subr.bf16.mxu0 %v1632_v0  ;;  %1270 = vmatprep.subr.bf16.mxu1 %v1632_v0 }
  0xa7   : > { %1227 = vmatmul.mubr.bf16.vlgmr.msra.gmra.mrb[0].mxu0 %v1917_v14 }
  0xa8   : > { %1251 = vmatpush3.bf16.msra.mxu0 %v1405_v16  ;;  %1266 = vmatprep.mubr.msk.bf16.mxu0 %vm1633_vm0, %v1632_v0  ;;  %v1146_v16 = vld [vmem:[%s2023_s4] ss:$0 sm:$0xff] }
  0xa9   : > { %1252 = vmatprep.subr.bf16.mxu0 %v1632_v0 }
  0xac   : > { %1253 = vmatpush3.bf16.msra.mxu0 %v1407_v17 }
  0xad   : > { %1254 = vmatprep.subr.bf16.mxu0 %v1632_v0 }
  0xb0   : > { %1255 = vmatpush3.bf16.msra.mxu0 %v1409_v18 }
  0xb1   : > { %1256 = vmatprep.subr.bf16.mxu0 %v1632_v0 }
  0xb4   : > { %1257 = vmatpush3.bf16.msra.mxu0 %v1411_v19 }
  0xb5   : > { %1258 = vmatprep.subr.bf16.mxu0 %v1632_v0 }
  0xb8   : > { %1259 = vmatpush3.bf16.msra.mxu0 %v1413_v20 }
  0xb9   : > { %1260 = vmatprep.subr.bf16.mxu0 %v1632_v0 }
  0xbc   : > { %1261 = vmatpush3.bf16.msra.mxu0 %v1415_v22 }
  0xbd   : > { %1262 = vmatprep.subr.bf16.mxu0 %v1632_v0 }
  0xc0   : > { %1263 = vmatpush3.bf16.msra.mxu0 %v1417_v24 }
  0xc1   : > { %1264 = vmatprep.subr.bf16.mxu0 %v1632_v0 }
  0xc4   : > { %1265 = vmatpush3.bf16.msra.mxu0 %v1418_v25 }
  0xc5   : > { %1290 = vmatprep.subr.bf16.mxu0 %v1632_v0 }
 0x17a   : > { %v457_v29 = vpop.f32.mrb[0].mxu0 }
 0x17b   : > { %v458_v30 = vadd.f32 %v1104_v27, %v457_v29  ;;  %v1228_v31 = vpop.f32.mrb[1].mxu0 }
 0x17c   : > { %v460_v32 = vpop.f32.mrb[2].mxu0  ;;  %v966_v31 = vunpack.c.h.bf16 %v1917_v14 }
 0x17d   : > { %v464_v34 = vmax.f32 %v458_v30, 0.0  ;;  %v461_v35 = vadd.f32 %v1104_v27, %v460_v32  ;;  %v1229_v36 = vpop.f32.mrb[3].mxu0  ;;  %v965_v27 = vunpack.c.l.bf16 %v1917_v14 }
 0x17f   : > { %v465_v37 = vmax.f32 %v461_v35, 0.0  ;;  %v495_v38 = vrot.slane %v464_v34, 7  ;;  %v508_v40 = vrot.slane %v464_v34, 1 }
 0x181   : > { %v496_v41 = vrot.slane %v465_v37, 7  ;;  %v509_v42 = vrot.slane %v465_v37, 1  ;;  %v519_v43 = vpack.c.bf16 %v465_v37, %v464_v34 }
 0x183   : > { %v498_v44 = vsel %vm497_vm1, %v495_v38, %v496_v41  ;;  %v499_v45 = vsel %vm497_vm1, %v496_v41, %v495_v38  ;;  %v511_v46 = vsel %vm510_vm2, %v508_v40, %v509_v42  ;;  %v512_v47 = vsel %vm510_vm2, %v509_v42, %v508_v40  ;;  %1247 = vmatmul.mubr.bf16.vlgmr.msra.gmra.mrb[0].mxu1 %v519_v43 }
 0x184   : > { %v1132_v48 = vpack.c.bf16 %v498_v44, %v499_v45  ;;  %v1144_v49 = vpack.c.bf16 %v512_v47, %v511_v46  ;;  %1271 = vmatpush3.bf16.msra.mxu1 %v1419_v39  ;;  %1286 = vmatprep.mubr.msk.bf16.mxu1 %vm1633_vm0, %v1632_v0 }
 0x185   : > { %1272 = vmatprep.subr.bf16.mxu1 %v1632_v0 }
 0x186   : > { %1267 = vmatmul.mubr.msk.bf16.vlgmr.msra.gmra.mrb[4].mxu0 %vm1131_vm5, %v1132_v48 }
 0x187   : > { %1306 = vmatprep.mubr.msk.bf16.mxu0 %vm1633_vm0, %v1632_v0  ;;  %1291 = vmatpush3.bf16.msra.mxu0 %v1427_v59 }
 0x188   : > { %1273 = vmatpush3.bf16.msra.mxu1 %v1420_v50  ;;  %1292 = vmatprep.subr.bf16.mxu0 %v1632_v0 }
 0x189   : > { %1274 = vmatprep.subr.bf16.mxu1 %v1632_v0 }
 0x18b   : > { %1293 = vmatpush3.bf16.msra.mxu0 %v1428_v60 }
 0x18c   : > { %1275 = vmatpush3.bf16.msra.mxu1 %v1421_v51  ;;  %1294 = vmatprep.subr.bf16.mxu0 %v1632_v0 }
 0x18d   : > { %1276 = vmatprep.subr.bf16.mxu1 %v1632_v0 }
 0x18f   : > { %1295 = vmatpush3.bf16.msra.mxu0 %v1429_v61 }
 0x190   : > { %1277 = vmatpush3.bf16.msra.mxu1 %v1422_v52  ;;  %1296 = vmatprep.subr.bf16.mxu0 %v1632_v0 }
 0x191   : > { %1278 = vmatprep.subr.bf16.mxu1 %v1632_v0 }
 0x193   : > { %1297 = vmatpush3.bf16.msra.mxu0 %v1430_v62 }
 0x194   : > { %1279 = vmatpush3.bf16.msra.mxu1 %v1423_v53  ;;  %1298 = vmatprep.subr.bf16.mxu0 %v1632_v0 }
 0x195   : > { %1280 = vmatprep.subr.bf16.mxu1 %v1632_v0 }
 0x197   : > { %1299 = vmatpush3.bf16.msra.mxu0 %v1431_v63 }
 0x198   : > { %1281 = vmatpush3.bf16.msra.mxu1 %v1424_v54  ;;  %1300 = vmatprep.subr.bf16.mxu0 %v1632_v0 }
 0x199   : > { %1282 = vmatprep.subr.bf16.mxu1 %v1632_v0 }
 0x19b   : > { %1301 = vmatpush3.bf16.msra.mxu0 %v1432_v1 }
 0x19c   : > { %1283 = vmatpush3.bf16.msra.mxu1 %v1425_v56  ;;  %1302 = vmatprep.subr.bf16.mxu0 %v1632_v0 }
 0x19d   : > { %1284 = vmatprep.subr.bf16.mxu1 %v1632_v0 }
 0x19f   : > { %1303 = vmatpush3.bf16.msra.mxu0 %v1433_v2 }
 0x1a0   : > { %1285 = vmatpush3.bf16.msra.mxu1 %v1426_v58  ;;  %1304 = vmatprep.subr.bf16.mxu0 %v1632_v0 }
 0x1a3   : > { %1287 = vmatmul.mubr.msk.bf16.vlgmr.msra.gmra.mrb[4].mxu1 %vm1143_vm7, %v1144_v49  ;;  %1305 = vmatpush3.bf16.msra.mxu0 %v1434_v3 }
 0x256   : > { %v636_v4 = vpop.f32.mrb[0].mxu1 }
 0x257   : > { %v1248_v5 = vpop.f32.mrb[1].mxu1 }
 0x258   : > { %v639_v6 = vpop.f32.mrb[2].mxu1 }
 0x259   : > { %v1249_v7 = vpop.f32.mrb[3].mxu1  ;;  %v725_v8 = vpop.f32.mrb[4].mxu0 }
 0x25a   : > { %v726_v9 = vadd.f32 %v725_v8, %v636_v4  ;;  %v1268_v10 = vpop.f32.mrb[5].mxu0 }
 0x25b   : > { %v728_v11 = vpop.f32.mrb[6].mxu0 }
 0x25c   : > { %v729_v12 = vadd.f32 %v728_v11, %v639_v6  ;;  %v1269_v13 = vpop.f32.mrb[7].mxu0 }
 0x276   : > { %v832_v15 = vpop.f32.mrb[4].mxu1 }
 0x277   : > { %v839_v17 = vadd.f32 %v832_v15, %v726_v9  ;;  %v1288_v0 = vpop.f32.mrb[5].mxu1 }
 0x278   : > { %v835_v18 = vpop.f32.mrb[6].mxu1 }
 0x279   : > { %v848_v19 = vadd.f32 %v1146_v16, %v839_v17  ;;  %v840_v20 = vadd.f32 %v835_v18, %v729_v12  ;;  %v1289_v21 = vpop.f32.mrb[7].mxu1 }
 0x27b   : > { %v849_v22 = vadd.f32 %v1146_v16, %v840_v20  ;;  %v850_v23 = vmax.f32 %v848_v19, 0.0 }
 0x27d   : > { %v851_v24 = vmax.f32 %v849_v22, 0.0 }
 0x27f   : > { %v852_v25 = vpack.c.bf16 %v851_v24, %v850_v23 }
 0x281   : > { %1307 = vmatmul.mubr.bf16.vlgmr.msra.gmra.mrb[8].mxu0 %v852_v25 }
 0x354   : > { %v958_v28 = vpop.f32.mrb[8].mxu0 }
 0x355   : > { %v959_v29 = vadd.f32 %v1147_v26, %v958_v28  ;;  %v1308_v30 = vpop.f32.mrb[9].mxu0 }
 0x356   : > { %v961_v32 = vpop.f32.mrb[10].mxu0 }
 0x357   : > { %v967_v33 = vadd.f32 %v965_v27, %v959_v29  ;;  %v962_v34 = vadd.f32 %v1147_v26, %v961_v32  ;;  %v1309_v35 = vpop.f32.mrb[11].mxu0 }
 0x359   : > { %v969_v36 = vmax.f32 %v967_v33, 0.0  ;;  %v968_v37 = vadd.f32 %v966_v31, %v962_v34 }
 0x35b   : > { %971 = vst [vmem:[%s340_s12] sm:$0xff] %v969_v36  ;;  %v970_v14 = vmax.f32 %v968_v37, 0.0 }
 0x35d   : > { %972 = vst [vmem:[%s340_s12 + $0x8] sm:$0xff] %v970_v14 }
 0x35e   : > { %1563 = shalt.err (!%p1560_p4)
}
 0x35f   : > { %s1564_s15 = scalar_lea.hbm %s1975_s11, 256  ;;  %s1568_s8 = scalar_lea.hbm %s2026_s7, 512 }
 0x360   : > { %p1565_p9 = scmp.ne.s32.totalorder %s1975_s11, %s1564_s15  ;;  %p1569_p8 = scmp.lt.u32.totalorder %s1975_s11, %s2026_s7 }
 0x361   : > { %p1570_p13 = scmp.lt.u32.totalorder %s1568_s8, %s1564_s15  ;;  %p1572_p10 = scmp.lt.u32.totalorder %s1564_s15, %s1975_s11 }
 0x362   : > { %p1566_p0 = pnand %p1565_p9, %p1832_p5 }
 0x363   : > { %p1571_p6 = por %p1570_p13, %p1569_p8 }
 0x364   : > { %p1567_p11 = pneg %p1566_p0 }
 0x365   : > { %p1573_p3 = por %p1572_p10, %p1571_p6 }
 0x367   : > { %p1574_p7 = pnand %p1573_p3, %p1567_p11 }
 0x369   : > { %1577 = shalt.err (!%p1574_p7)
}
 0x36a   : > { %s1636_s29 = smov 128   ;;  %s1637_s23 = smov 8  }
 0x36b   : > { %1324 = dma.vmem_to_hbm [thread:$0]  (%p1832_p5), %s1970_s21, 256, %s1975_s11, %s974_s20, %s1636_s29, %s1636_s29, %s1637_s23  }
 0x36c PF: > { %s2046_s30 = sld [smem:[#allocation15_spill]]  ;;  %s1002_s28 = sand.u32 1, %s1612_s24  }
 0x36d   : > { %p2048_p1 = scmp.ge.s32.totalorder %s1624_s27, 2  ;;  %s1003_s9 = scalar_lea.sflag [#allocation4], %s1002_s28 }
 0x372   : > { %p2047_p12 = scmp.ne.s32.totalorder %s2046_s30, 0 }
 0x374   : > { %p1341_p2 = pnand %p2048_p1, %p2047_p12 }
 0x376   : > { %1607 = dma.done.wait (!%p1341_p2), %s1003_s9, 256  }
 0x377   : > { %1609 = vsyncadd (!%p1341_p2), %s1003_s9, 4294967040  ;;  %p22_p4 = scmp.ge.s32.totalorder %s1818_s22, 4   ;;  %s2049_s24 = smov %s1616_s25 }
 0x378   : > { %s2050_s25 = smov %s1620_s26  ;;  %s2051_s26 = smov %s1828_s18 }
 0x379   : > { %s2052_s27 = smov %s1818_s22  ;;  %24 = sbr.rel (!%p22_p4) target bundleno = 7 (0x7), region = 107 }
 0x380   :  { %1008 = vsyncpa [#allocation3], 1 }
 0x381   :  { %1010 = vsyncpa [#allocation3 + $0x1], 1 }
 0x382   :  { %1011 = vsyncpa [#allocation6], 1 }
 0x383   :  { %1012 = vsyncpa [#allocation9], 1 }
 0x384   :  { %1013 = vsyncpa [#allocation4], 1 }
 0x385   :  { %1015 = vsyncpa [#allocation4 + $0x1], 1 }

</bundles_post_ra>
